<compile_context>
chip_gen: v5e
topology: v5e:2x2
jax: 0.10.0
libtpu: 0.0.40
codegen_flags: <defaults>
</compile_context>

<pallas_src>
import jax
import jax.numpy as jnp
import numpy as np
from jax.experimental import pallas as pl
from jax.experimental.pallas import tpu as pltpu

_LANE = 128


def _round_up(x, m):
    return (x + m - 1) // m * m


def _choose_tile_b(B, target=1024):
    """Batch rows per grid step.

    Kernel is HBM/overhead-bound, so tiles are large (~1024 rows).  Prefer a tile
    that divides B exactly (no padding copy of the dominant feature stream); >=2
    grid steps happen automatically once B > target (feeds both v7x TensorCores).
    """
    Bp8 = _round_up(B, 8)
    if Bp8 <= target:
        return Bp8                      # single step: whole batch in one resident tile
    for t in range(target, 7, -8):      # largest multiple-of-8 divisor of B <= target
        if B % t == 0:
            return t
    return target                       # fall back to padding the ragged tail


# -------- fused kernel: (folded) embedding gather + Linear -> ReLU -> Linear --------
def _fused_kernel(ids_ref, feat_ref, w1e_ref, w1f_ref, b1_ref, w2_ref, b2_ref,
                  out_ref):
    tile_b = ids_ref.shape[0]
    num_items = w1e_ref.shape[0]
    op_dtype = w1e_ref.dtype

    # Embedding gather folded into layer 1: emb @ W1[:E,:] == onehot @ (table @ W1[:E,:]).
    # One-hot row-select is exact (0/1 weights); num_items is small, so the folded
    # table (num_items, Hp) stays VMEM-resident across all grid steps.
    ids = ids_ref[...]                                                   # (TILE_B, 1) int32
    iota = jax.lax.broadcasted_iota(jnp.int32, (tile_b, num_items), 1)   # (TILE_B, num_items)
    onehot = (iota == ids).astype(op_dtype)

    h = jnp.dot(onehot, w1e_ref[...], preferred_element_type=jnp.float32)
    h = h + jnp.dot(feat_ref[...], w1f_ref[...], preferred_element_type=jnp.float32)
    h = h + b1_ref[...]                           # f32 bias add (VPU; f32 on v5e too)
    h = jnp.maximum(h, 0.0)                       # ReLU (VPU, f32)
    o = jnp.dot(h.astype(w2_ref.dtype), w2_ref[...],
                preferred_element_type=jnp.float32) + b2_ref[...]
    out_ref[...] = o.astype(out_ref.dtype)


# -------- once-per-model host prep: fold table into W1, pad H, optional bf16 --------
def prepare_params(params, *, operand_dtype=jnp.float32):
    table, w1, b1, w2, b2 = (params["emb"], params["w1"], params["b1"],
                             params["w2"], params["b2"])
    num_items, E = table.shape
    _, H = w1.shape
    Hp = _round_up(H, _LANE)                                  # lane-pad hidden dim only

    w1f32 = jnp.pad(w1.astype(jnp.float32), ((0, 0), (0, Hp - H)))
    w1_emb = (table.astype(jnp.float32) @ w1f32[:E, :]).astype(operand_dtype)   # (num_items, Hp)
    w1_feat = w1f32[E:, :].astype(operand_dtype)                                # ((F-1)*E, Hp)
    b1p = jnp.pad(b1.astype(jnp.float32), (0, Hp - H)).reshape(1, Hp)           # f32
    w2p = jnp.pad(w2.astype(jnp.float32), ((0, Hp - H), (0, 0))).astype(operand_dtype)  # (Hp, E)
    b2p = b2.astype(jnp.float32).reshape(1, E)                                   # f32
    return {"w1_emb": w1_emb, "w1_feat": w1_feat, "b1": b1p, "w2": w2p,
            "b2": b2p, "operand_dtype": operand_dtype}


def deep_embedding_forward(prep, item_ids, features):
    w1e, w1f, b1, w2, b2 = (prep["w1_emb"], prep["w1_feat"], prep["b1"],
                            prep["w2"], prep["b2"])
    op_dtype = prep["operand_dtype"]
    num_items, Hp = w1e.shape
    E = w2.shape[1]

    B = features.shape[0]
    feat_flat = features.reshape(B, -1).astype(op_dtype)      # contiguous view (free) + opt. cast
    fm1e = feat_flat.shape[1]                                 # (num_features-1)*E
    ids2d = item_ids.reshape(B, 1).astype(jnp.int32)

    TILE_B = _choose_tile_b(B)
    Bp = _round_up(B, TILE_B)
    if Bp != B:   # rare: only when no multiple-of-8 divisor of B exists near the target
        ids2d = jnp.pad(ids2d, ((0, Bp - B), (0, 0)))
        feat_flat = jnp.pad(feat_flat, ((0, Bp - B), (0, 0)))

    out = pl.pallas_call(
        _fused_kernel,
        out_shape=jax.ShapeDtypeStruct((Bp, E), jnp.float32),
        grid_spec=pltpu.PrefetchScalarGridSpec(
            num_scalar_prefetch=0,
            grid=(Bp // TILE_B,),
            in_specs=[
                pl.BlockSpec((TILE_B, 1), lambda i: (i, 0)),         # item ids
                pl.BlockSpec((TILE_B, fm1e), lambda i: (i, 0)),      # flattened features
                pl.BlockSpec((num_items, Hp), lambda i: (0, 0)),     # table@W1[:E]  (resident)
                pl.BlockSpec((fm1e, Hp), lambda i: (0, 0)),          # W1[E:]        (resident)
                pl.BlockSpec((1, Hp), lambda i: (0, 0)),             # b1
                pl.BlockSpec((Hp, E), lambda i: (0, 0)),             # W2            (resident)
                pl.BlockSpec((1, E), lambda i: (0, 0)),              # b2
            ],
            out_specs=pl.BlockSpec((TILE_B, E), lambda i: (i, 0)),   # unpadded (B, E) output
        ),
        compiler_params=pltpu.CompilerParams(
            dimension_semantics=("parallel",)),
    )(ids2d, feat_flat, w1e, w1f, b1, w2, b2)

    return out if Bp == B else out[:B]


# ---------------- pure-JAX reference (for verification) ----------------
def reference(params, item_ids, features):
    emb = params["emb"][item_ids]
    x = jnp.concatenate([emb, features.reshape(features.shape[0], -1)], axis=1)
    h = jnp.maximum(x @ params["w1"] + params["b1"], 0.0)
    return h @ params["w2"] + params["b2"]


if __name__ == "__main__":
    key = jax.random.PRNGKey(0)
    num_items, num_features, E, H, B = 16, 4, 32, 64, 8
    ks = jax.random.split(key, 7)

    # deterministic synthetic parameters (shapes per DeepEmbedding.__init__)
    params = {
        "emb": jax.random.normal(ks[0], (num_items, E), jnp.float32),
        "w1": jax.random.normal(ks[1], (num_features * E, H), jnp.float32) * 0.05,
        "b1": jax.random.normal(ks[2], (H,), jnp.float32) * 0.01,
        "w2": jax.random.normal(ks[3], (H, E), jnp.float32) * 0.05,
        "b2": jax.random.normal(ks[4], (E,), jnp.float32) * 0.01,
    }

    # inputs: item_ids (B,), features (B, num_features-1, E) so that
    # E + (num_features-1)*E == num_features*E matches the first Linear's in_features.
    item_ids = jax.random.randint(ks[5], (B,), 0, num_items, jnp.int32)
    features = jax.random.normal(ks[6], (B, num_features - 1, E), jnp.float32)

    prep = prepare_params(params)                     # once-per-model host prep (hoisted)
    out = deep_embedding_forward(prep, item_ids, features)
    out = jax.block_until_ready(out)

    ref = reference(params, item_ids, features)
    assert out.shape == (B, E)
    np.testing.assert_allclose(np.asarray(out), np.asarray(ref),
                               rtol=1e-5, atol=1e-5)
    print("KERNEL_OK")
</pallas_src>

<mosaic_0001>
module attributes {stable_mosaic.version = 11 : i64} {
  func.func @_fused_kernel(%arg0: i32, %arg1: memref<8x1xi32, #tpu.memory_space<vmem>>, %arg2: memref<8x96xf32, #tpu.memory_space<vmem>>, %arg3: memref<16x128xf32, #tpu.memory_space<vmem>>, %arg4: memref<96x128xf32, #tpu.memory_space<vmem>>, %arg5: memref<1x128xf32, #tpu.memory_space<vmem>>, %arg6: memref<128x32xf32, #tpu.memory_space<vmem>>, %arg7: memref<1x32xf32, #tpu.memory_space<vmem>>, %arg8: memref<8x32xf32, #tpu.memory_space<vmem>>) attributes {dimension_semantics = [#tpu.dimension_semantics<parallel>], iteration_bounds = array<i64: 1>, scalar_prefetch = 0 : i64, scratch_operands = 0 : i64, tpu.core_type = #tpu.core_type<tc>, window_params = [{transform_indices = @transform_0, window_bounds = array<i64: 8, 1>}, {transform_indices = @transform_1, window_bounds = array<i64: 8, 96>}, {pipeline_mode = #tpu.pipeline_mode<synchronous>, transform_indices = @transform_2, window_bounds = array<i64: 16, 128>}, {pipeline_mode = #tpu.pipeline_mode<synchronous>, transform_indices = @transform_3, window_bounds = array<i64: 96, 128>}, {pipeline_mode = #tpu.pipeline_mode<synchronous>, transform_indices = @transform_4, window_bounds = array<i64: 1, 128>}, {pipeline_mode = #tpu.pipeline_mode<synchronous>, transform_indices = @transform_5, window_bounds = array<i64: 128, 32>}, {pipeline_mode = #tpu.pipeline_mode<synchronous>, transform_indices = @transform_6, window_bounds = array<i64: 1, 32>}, {transform_indices = @transform_7, window_bounds = array<i64: 8, 32>}]} {
    %c0 = arith.constant 0 : index
    %c0_0 = arith.constant 0 : index
    %0 = vector.load %arg1[%c0, %c0_0] : memref<8x1xi32, #tpu.memory_space<vmem>>, vector<8x1xi32>
    %1 = tpu.iota {dimensions = array<i32: 1>} : vector<8x16xi32>
    %2 = vector.broadcast %0 : vector<8x1xi32> to vector<8x16xi32>
    %3 = arith.cmpi eq, %1, %2 : vector<8x16xi32>
    %4 = arith.extui %3 : vector<8x16xi1> to vector<8x16xi32>
    %5 = arith.sitofp %4 : vector<8x16xi32> to vector<8x16xf32>
    %c0_1 = arith.constant 0 : index
    %c0_2 = arith.constant 0 : index
    %6 = vector.load %arg3[%c0_1, %c0_2] : memref<16x128xf32, #tpu.memory_space<vmem>>, vector<16x128xf32>
    %cst = arith.constant dense<0.000000e+00> : vector<8x128xf32>
    %7 = tpu.matmul %5, %6, %cst {dimension_numbers = #tpu.dot_dimension_numbers<[1], [0], [0], [1], [0, 0, 1, 1], [], []>} : vector<8x16xf32>, vector<16x128xf32>, vector<8x128xf32> -> vector<8x128xf32>
    %c0_3 = arith.constant 0 : index
    %c0_4 = arith.constant 0 : index
    %8 = vector.load %arg2[%c0_3, %c0_4] : memref<8x96xf32, #tpu.memory_space<vmem>>, vector<8x96xf32>
    %c0_5 = arith.constant 0 : index
    %c0_6 = arith.constant 0 : index
    %9 = vector.load %arg4[%c0_5, %c0_6] : memref<96x128xf32, #tpu.memory_space<vmem>>, vector<96x128xf32>
    %cst_7 = arith.constant dense<0.000000e+00> : vector<8x128xf32>
    %10 = tpu.matmul %8, %9, %cst_7 {dimension_numbers = #tpu.dot_dimension_numbers<[1], [0], [0], [1], [0, 0, 1, 1], [], []>} : vector<8x96xf32>, vector<96x128xf32>, vector<8x128xf32> -> vector<8x128xf32>
    %11 = arith.addf %7, %10 : vector<8x128xf32>
    %c0_8 = arith.constant 0 : index
    %c0_9 = arith.constant 0 : index
    %12 = vector.load %arg5[%c0_8, %c0_9] : memref<1x128xf32, #tpu.memory_space<vmem>>, vector<1x128xf32>
    %13 = vector.broadcast %12 : vector<1x128xf32> to vector<8x128xf32>
    %14 = arith.addf %11, %13 : vector<8x128xf32>
    %cst_10 = arith.constant 0.000000e+00 : f32
    %15 = vector.broadcast %cst_10 : f32 to vector<8x128xf32>
    %16 = arith.maximumf %14, %15 : vector<8x128xf32>
    %c0_11 = arith.constant 0 : index
    %c0_12 = arith.constant 0 : index
    %17 = vector.load %arg6[%c0_11, %c0_12] : memref<128x32xf32, #tpu.memory_space<vmem>>, vector<128x32xf32>
    %cst_13 = arith.constant dense<0.000000e+00> : vector<8x32xf32>
    %18 = tpu.matmul %16, %17, %cst_13 {dimension_numbers = #tpu.dot_dimension_numbers<[1], [0], [0], [1], [0, 0, 1, 1], [], []>} : vector<8x128xf32>, vector<128x32xf32>, vector<8x32xf32> -> vector<8x32xf32>
    %c0_14 = arith.constant 0 : index
    %c0_15 = arith.constant 0 : index
    %19 = vector.load %arg7[%c0_14, %c0_15] : memref<1x32xf32, #tpu.memory_space<vmem>>, vector<1x32xf32>
    %20 = vector.broadcast %19 : vector<1x32xf32> to vector<8x32xf32>
    %21 = arith.addf %18, %20 : vector<8x32xf32>
    %c0_16 = arith.constant 0 : index
    %c0_17 = arith.constant 0 : index
    %22 = vector.load %arg8[%c0_16, %c0_17] : memref<8x32xf32, #tpu.memory_space<vmem>>, vector<8x32xf32>
    tpu.vector_store %arg8[%c0_16, %c0_17], %21 {strides = array<i32>} : memref<8x32xf32, #tpu.memory_space<vmem>>, vector<8x32xf32>,
    return
  }
  func.func @transform_0(%arg0: i32) -> (i32, i32) {
    %c0_i32 = arith.constant 0 : i32
    %c0_i32_0 = arith.constant 0 : i32
    return %arg0, %c0_i32 : i32, i32
  }
  func.func @transform_1(%arg0: i32) -> (i32, i32) {
    %c0_i32 = arith.constant 0 : i32
    %c0_i32_0 = arith.constant 0 : i32
    return %arg0, %c0_i32 : i32, i32
  }
  func.func @transform_2(%arg0: i32) -> (i32, i32) {
    %c0_i32 = arith.constant 0 : i32
    %c0_i32_0 = arith.constant 0 : i32
    %c0_i32_1 = arith.constant 0 : i32
    return %c0_i32, %c0_i32_0 : i32, i32
  }
  func.func @transform_3(%arg0: i32) -> (i32, i32) {
    %c0_i32 = arith.constant 0 : i32
    %c0_i32_0 = arith.constant 0 : i32
    %c0_i32_1 = arith.constant 0 : i32
    return %c0_i32, %c0_i32_0 : i32, i32
  }
  func.func @transform_4(%arg0: i32) -> (i32, i32) {
    %c0_i32 = arith.constant 0 : i32
    %c0_i32_0 = arith.constant 0 : i32
    %c0_i32_1 = arith.constant 0 : i32
    return %c0_i32, %c0_i32_0 : i32, i32
  }
  func.func @transform_5(%arg0: i32) -> (i32, i32) {
    %c0_i32 = arith.constant 0 : i32
    %c0_i32_0 = arith.constant 0 : i32
    %c0_i32_1 = arith.constant 0 : i32
    return %c0_i32, %c0_i32_0 : i32, i32
  }
  func.func @transform_6(%arg0: i32) -> (i32, i32) {
    %c0_i32 = arith.constant 0 : i32
    %c0_i32_0 = arith.constant 0 : i32
    %c0_i32_1 = arith.constant 0 : i32
    return %c0_i32, %c0_i32_0 : i32, i32
  }
  func.func @transform_7(%arg0: i32) -> (i32, i32) {
    %c0_i32 = arith.constant 0 : i32
    %c0_i32_0 = arith.constant 0 : i32
    return %arg0, %c0_i32 : i32, i32
  }
}

</mosaic_0001>

<bundles_post_ra>
// kernel: tpu_custom_call.1
= control target key start
LH: loop header
LB: loop body
LE: loop exit
PB: predicated region body
PF: predicated region fallthrough
CT: control target
= control target key end

     0   :  { %v198_v3 = vmov 0   ;;  %s346_s0 = inlined_call_operand.vmem [shape: s32[8,1], index: 0, kind: input, shape index: {}]   ;;  %s347_s1 = inlined_call_operand.vmem [shape: f32[8,96], index: 1, kind: input, shape index: {}]   ;;  %s348_s2 = inlined_call_operand.vmem [shape: f32[16,128], index: 2, kind: input, shape index: {}]   ;;  %s349_s3 = inlined_call_operand.vmem [shape: f32[96,128], index: 3, kind: input, shape index: {}]   ;;  %s350_s4 = inlined_call_operand.vmem [shape: f32[1,128], index: 4, kind: input, shape index: {}]   ;;  %s351_s5 = inlined_call_operand.vmem [shape: f32[128,32], index: 5, kind: input, shape index: {}]   ;;  %s352_s6 = inlined_call_operand.vmem [shape: f32[1,32], index: 6, kind: input, shape index: {}]   ;;  %s353_s7 = inlined_call_operand.hbm [shape: f32[8,32], index: 7, kind: output, shape index: {}]  }
   0x1   :  { %v27_v0 = vld [vmem:[%s346_s0] sm:$0xff]  ;;  %v50_v1 = vld [vmem:[%s349_s3 + $0x58] sm:$0xff]  ;;  %v49_v2 = vld [vmem:[%s349_s3 + $0x50] sm:$0xff]  ;;  %169 = vset.pattern.permute.xlu0 %v198_v3 }
   0x2   :  { %59 = vmatpush.msra.mxu0 %v50_v1  ;;  %31 = vperm.xlu0 %169, %v27_v0   ;;  %v48_v4 = vld [vmem:[%s349_s3 + $0x48] sm:$0xff]  ;;  %v47_v5 = vld [vmem:[%s349_s3 + $0x40] sm:$0xff] }
   0x3   :  { %v37_v6 = vld [vmem:[%s348_s2 + $0x8] sm:$0xff] }
   0x4   :  { %60 = vmatpush.msra.mxu0 %v49_v2  ;;  %93 = vmatpush.msra.mxu1 %v37_v6 }
   0x6   :  { %61 = vmatpush.msra.mxu0 %v48_v4 }
   0x7   :  { %12 = vsyncpa [#allocation3], 0  ;;  %v46_v7 = vld [vmem:[%s349_s3 + $0x38] sm:$0xff]  ;;  %v45_v8 = vld [vmem:[%s349_s3 + $0x30] sm:$0xff]  ;;  %vm51_vm0 = vcmask 785408   ;;  %v28_v29 = vlaneseq  ;;  %vm75_vm1 = vcmask 130048  }
   0x8   :  { %62 = vmatpush.msra.mxu0 %v47_v5  ;;  %v44_v9 = vld [vmem:[%s349_s3 + $0x28] sm:$0xff]  ;;  %v43_v10 = vld [vmem:[%s349_s3 + $0x20] sm:$0xff]  ;;  %v42_v11 = vld [vmem:[%s349_s3 + $0x18] sm:$0xff]  ;;  %v199_v32 = vmov 0.0   ;;  %s200_s14 = smov [#allocation2]   ;;  %s154_s17 = sshll.u32 %s353_s7, 4  ;;  %s155_s17 = int_to_ptr.hbm [resolvable:$true] %s154_s17 }
   0x9   :  { %v41_v12 = vld [vmem:[%s349_s3 + $0x10] sm:$0xff]  ;;  %v40_v13 = vld [vmem:[%s349_s3 + $0x8] sm:$0xff]  ;;  %v39_v14 = vld [vmem:[%s349_s3] sm:$0xff]  ;;  %v29_v30 = vand.u32 127, %v28_v29  ;;  %s152_s15 = sshll.u32 %s200_s14, 4  ;;  %vm145_vm3 = vcmask 261120   ;;  %s153_s15 = int_to_ptr.vmem [resolvable:$true] %s152_s15 }
   0xa   :  { %63 = vmatpush.msra.mxu0 %v46_v7  ;;  %v36_v15 = vld [vmem:[%s348_s2] sm:$0xff]  ;;  %v120_v17 = vld [vmem:[%s351_s5 + $0x78] sm:$0xff]  ;;  %v119_v18 = vld [vmem:[%s351_s5 + $0x70] sm:$0xff] }
   0xb   :  { %94 = vmatpush.msra.mxu1 %v36_v15  ;;  %v38_v16 = vld [vmem:[%s347_s1] sm:$0xff]  ;;  %125 = vmatpush.msra.mxu2 %v120_v17  ;;  %v118_v19 = vld [vmem:[%s351_s5 + $0x68] sm:$0xff]  ;;  %v116_v21 = vld [vmem:[%s351_s5 + $0x58] sm:$0xff] }
   0xc   :  { %64 = vmatpush.msra.mxu0 %v45_v8  ;;  %v117_v20 = vld [vmem:[%s351_s5 + $0x60] sm:$0xff]  ;;  %v115_v22 = vld [vmem:[%s351_s5 + $0x50] sm:$0xff]  ;;  %v114_v23 = vld [vmem:[%s351_s5 + $0x48] sm:$0xff] }
   0xd   :  { %126 = vmatpush.msra.mxu2 %v119_v18  ;;  %v113_v24 = vld [vmem:[%s351_s5 + $0x40] sm:$0xff]  ;;  %v112_v25 = vld [vmem:[%s351_s5 + $0x38] sm:$0xff]  ;;  %v111_v26 = vld [vmem:[%s351_s5 + $0x30] sm:$0xff] }
   0xe   :  { %65 = vmatpush.msra.mxu0 %v44_v9  ;;  %v110_v27 = vld [vmem:[%s351_s5 + $0x28] sm:$0xff]  ;;  %v109_v28 = vld [vmem:[%s351_s5 + $0x20] sm:$0xff]  ;;  %v108_v34 = vld [vmem:[%s351_s5 + $0x18] sm:$0xff] }
   0xf   :  { %127 = vmatpush.msra.mxu2 %v118_v19  ;;  %v107_v35 = vld [vmem:[%s351_s5 + $0x10] sm:$0xff]  ;;  %v106_v36 = vld [vmem:[%s351_s5 + $0x8] sm:$0xff]  ;;  %v105_v37 = vld [vmem:[%s351_s5] sm:$0xff] }
  0x10   :  { %66 = vmatpush.msra.mxu0 %v43_v10  ;;  %v170_v39 = vld [vmem:[%s350_s4] ss:$0 sm:$0xff] }
  0x11   :  { %128 = vmatpush.msra.mxu2 %v117_v20  ;;  %v171_v44 = vld [vmem:[%s352_s6] ss:$0 sm:$0xff] }
  0x12   :  { %67 = vmatpush.msra.mxu0 %v42_v11 }
  0x13   :  { %129 = vmatpush.msra.mxu2 %v116_v21 }
  0x14   :  { %68 = vmatpush.msra.mxu0 %v41_v12 }
  0x15   :  { %130 = vmatpush.msra.mxu2 %v115_v22 }
  0x16   :  { %69 = vmatpush.msra.mxu0 %v40_v13 }
  0x17   :  { %131 = vmatpush.msra.mxu2 %v114_v23 }
  0x18   :  { %70 = vmatpush.msra.mxu0 %v39_v14 }
  0x19   :  { %164 = vmatmul.msk.f32.vlgmr.msra.gmra.mxu0 %vm51_vm0, %v38_v16  ;;  %132 = vmatpush.msra.mxu2 %v113_v24 }
  0x1b   :  { %133 = vmatpush.msra.mxu2 %v112_v25 }
  0x1d   :  { %134 = vmatpush.msra.mxu2 %v111_v26 }
  0x1f   :  { %135 = vmatpush.msra.mxu2 %v110_v27 }
  0x21   :  { %136 = vmatpush.msra.mxu2 %v109_v28 }
  0x23   :  { %137 = vmatpush.msra.mxu2 %v108_v34 }
  0x25   :  { %138 = vmatpush.msra.mxu2 %v107_v35 }
  0x27   :  { %139 = vmatpush.msra.mxu2 %v106_v36 }
  0x29   :  { %140 = vmatpush.msra.mxu2 %v105_v37 }
  0x74   :  { %v32_v31 = vpop.permute.xlu0 %31 }
  0x75   :  { %vm33_vm2 = vcmp.eq.s32.totalorder %v29_v30, %v32_v31 }
  0x76   :  { %v163_v33 = vsel %vm33_vm2, 1.0, %v199_v32 }
  0x77   :  { %165 = vmatmul.msk.f32.vlgmr.msra.gmra.mxu1 %vm75_vm1, %v163_v33 }
  0x96   :  { %v72_v38 = vpop.f32.mrf.mxu0 }
  0xf4   :  { %v96_v40 = vpop.f32.mrf.mxu1 }
  0xf5   :  { %v97_v41 = vadd.f32 %v96_v40, %v72_v38 }
  0xf7   :  { %v103_v42 = vadd.f32 %v170_v39, %v97_v41 }
  0xf9   :  { %v104_v43 = vmax.f32 %v103_v42, 0.0 }
  0xfb   :  { %141 = vmatmul.f32.vlgmr.msra.gmra.mxu2 %v104_v43 }
 0x17e   :  { %v142_v45 = vpop.f32.mrf.mxu2 }
 0x17f   :  { %v143_v46 = vadd.f32 %v171_v44, %v142_v45 }
 0x181   :  { %146 = vst.msk [vmem:[#allocation2] sm:$0xff] %vm145_vm3, %v143_v46 }
 0x182   :  { %157 = dma.vmem_to_hbm [thread:$0]  %s153_s15, 128, %s155_s17, [#allocation3]  }
 0x183   :  { %196 = dma.done.wait [#allocation3], 128  }
 0x184   :  { %197 = vsyncadd [#allocation3], 4294967168 }
 0x185   :  { %162 = vsyncpa [#allocation3], 1 }

</bundles_post_ra>
